<compile_context>
chip_gen: v7x
topology: tpu7x:2x2x1
jax: 0.10.0
libtpu: 0.0.40
codegen_flags: <defaults>
</compile_context>

<pallas_src>
import jax
import jax.numpy as jnp
from jax.experimental import pallas as pl
from jax.experimental.pallas import tpu as pltpu


def _round_up(x, m):
    return (x + m - 1) // m * m


# ----------------------------------------------------------------------------
# Kernel 1: ROIAlign as a per-ROI matmul (scalar-prefetched batch index)
# ----------------------------------------------------------------------------
def _roi_pool_kernel(batch_ref, feat_ref, wt_ref, o_ref):
    # feat_ref: (1, C, H*W) block of the image picked by batch_ref[r]
    # wt_ref:   (1, H*W, res*res) per-ROI bilinear interpolation matrix
    o_ref[0] = jnp.dot(
        feat_ref[0], wt_ref[0], preferred_element_type=jnp.float32
    ).astype(o_ref.dtype)


def _interp_weights(start, length, size, n_bins, sr):
    """Averaged bilinear weights [R, n_bins, size] (maskrcnn ROIAlign semantics).

    Built purely from broadcasted iota/compare ops — no gathers."""
    bin_sz = length / n_bins                                   # [R]
    p = jnp.arange(n_bins, dtype=jnp.float32)                  # [n_bins]
    j = jnp.arange(size, dtype=jnp.float32)                    # [size]
    acc = jnp.zeros((start.shape[0], n_bins, size), jnp.float32)
    for i in range(sr):                                        # static loop (sampling_ratio)
        c = start[:, None] + bin_sz[:, None] * (p[None, :] + (i + 0.5) / sr)   # [R, n_bins]
        valid = (c >= -1.0) & (c <= float(size))
        cc = jnp.maximum(c, 0.0)
        low = jnp.minimum(jnp.floor(cc), float(size - 1))
        high = jnp.minimum(low + 1.0, float(size - 1))
        cc = jnp.where(low >= float(size - 1), low, cc)
        l = cc - low
        h = 1.0 - l
        w = (h[..., None] * (j[None, None, :] == low[..., None]).astype(jnp.float32)
             + l[..., None] * (j[None, None, :] == high[..., None]).astype(jnp.float32))
        acc = acc + jnp.where(valid[..., None], w, 0.0)
    return acc / sr


def roi_align_pooler(feat_nchw, rois, resolution, spatial_scale, sampling_ratio):
    """feat: [N, C, H, W]; rois: [R, 5] = (batch_idx, x1, y1, x2, y2).

    Returns pooled features [R, C, res*res] (NCHW flatten order)."""
    N, C, H, W = feat_nchw.shape
    R = rois.shape[0]
    res = resolution

    batch_idx = rois[:, 0].astype(jnp.int32)
    x1 = rois[:, 1] * spatial_scale
    y1 = rois[:, 2] * spatial_scale
    x2 = rois[:, 3] * spatial_scale
    y2 = rois[:, 4] * spatial_scale
    roi_w = jnp.maximum(x2 - x1, 1.0)
    roi_h = jnp.maximum(y2 - y1, 1.0)

    ay = _interp_weights(y1, roi_h, H, res, sampling_ratio)    # [R, res, H]
    ax = _interp_weights(x1, roi_w, W, res, sampling_ratio)    # [R, res, W]
    # WT[r, y*W + x, ph*res + pw] = Ay[r, ph, y] * Ax[r, pw, x]
    wt = (jnp.swapaxes(ay, 1, 2)[:, :, None, :, None] *        # [R, H, 1, res, 1]
          jnp.swapaxes(ax, 1, 2)[:, None, :, None, :])         # [R, 1, W, 1, res]
    wt = wt.reshape(R, H * W, res * res).astype(jnp.float32)

    feat2d = feat_nchw.reshape(N, C, H * W)                    # free, keeps NCHW order

    grid_spec = pltpu.PrefetchScalarGridSpec(
        num_scalar_prefetch=1,                                 # batch_idx -> SMEM
        grid=(R,),
        in_specs=[
            pl.BlockSpec((1, C, H * W), lambda r, b: (b[r], 0, 0)),       # per-ROI image
            pl.BlockSpec((1, H * W, res * res), lambda r, b: (r, 0, 0)),  # per-ROI weights
        ],
        out_specs=pl.BlockSpec((1, C, res * res), lambda r, b: (r, 0, 0)),
    )
    return pl.pallas_call(
        _roi_pool_kernel,
        out_shape=jax.ShapeDtypeStruct((R, C, res * res), jnp.float32),
        grid_spec=grid_spec,
        compiler_params=pltpu.CompilerParams(dimension_semantics=("arbitrary",)),
    )(batch_idx, feat2d, wt)


# ----------------------------------------------------------------------------
# Kernel 2: fused MLP head  out = relu( relu(x @ W6 + b6) @ W7 + b7 )
# ----------------------------------------------------------------------------
def _fused_mlp_kernel(x_ref, w6_ref, b6_ref, w7_ref, b7_ref, o_ref, acc_ref):
    k = pl.program_id(1)

    @pl.when(k == 0)
    def _():
        acc_ref[...] = jnp.zeros_like(acc_ref)

    # fc6 partial product: bf16 x bf16 -> f32 accumulate on the MXU
    acc_ref[...] += jnp.dot(x_ref[...], w6_ref[...], preferred_element_type=jnp.float32)

    @pl.when(k == pl.num_programs(1) - 1)
    def _():
        h = jnp.maximum(acc_ref[...] + b6_ref[...], 0.0)            # fc6 bias + ReLU (f32)
        o = jnp.dot(h.astype(jnp.bfloat16), w7_ref[...],            # fc7 (hidden stays in VMEM)
                    preferred_element_type=jnp.float32) + b7_ref[...]
        o_ref[...] = jnp.maximum(o, 0.0).astype(o_ref.dtype)        # final ReLU


def fused_mlp(x, w6, b6, w7, b7, *, tm_max=256, tk_max=512):
    """x: [M, K] (any float dtype), w6: [K, D] bf16, w7: [D, D] bf16, b6/b7: [1, D] f32."""
    M, K = x.shape
    D = w6.shape[1]
    assert D % 128 == 0, "representation_size must be a multiple of 128 (lane-dense output)"

    # tile selection + padding (no divisibility requirement on M / K)
    tm = min(tm_max, _round_up(M, 8))
    Mp = _round_up(M, tm)
    Kp = _round_up(K, 128)
    tk = next(t for t in (tk_max, 256, 128) if Kp % t == 0)

    xb = x.astype(jnp.bfloat16)
    if (Mp, Kp) != (M, K):
        xb = jnp.pad(xb, ((0, Mp - M), (0, Kp - K)))
    w6p = jnp.pad(w6, ((0, Kp - K), (0, 0))) if Kp != K else w6

    grid = (Mp // tm, Kp // tk)
    out = pl.pallas_call(
        _fused_mlp_kernel,
        out_shape=jax.ShapeDtypeStruct((Mp, D), jnp.float32),
        grid_spec=pltpu.PrefetchScalarGridSpec(
            num_scalar_prefetch=0,
            grid=grid,
            in_specs=[
                pl.BlockSpec((tm, tk), lambda i, k: (i, k)),   # x tile
                pl.BlockSpec((tk, D), lambda i, k: (k, 0)),    # W6 K-slab
                pl.BlockSpec((1, D), lambda i, k: (0, 0)),     # b6
                pl.BlockSpec((D, D), lambda i, k: (0, 0)),     # W7 (resident)
                pl.BlockSpec((1, D), lambda i, k: (0, 0)),     # b7
            ],
            out_specs=pl.BlockSpec((tm, D), lambda i, k: (i, 0)),
            scratch_shapes=[pltpu.VMEM((tm, D), jnp.float32)],
        ),
        compiler_params=pltpu.CompilerParams(
            dimension_semantics=("parallel", "arbitrary"),
            vmem_limit_bytes=32 * 1024 * 1024,
        ),
    )(xb, w6p, b6, w7, b7)
    return out[:M]


# ----------------------------------------------------------------------------
# Parameters (deterministic synthetic, torch layout -> kernel layout, bf16 weights)
# ----------------------------------------------------------------------------
def make_mlp_params(key, in_channels, resolution, rep_size):
    k6, k7 = jax.random.split(key)
    fan6 = in_channels * resolution * resolution
    b6_bound = (3.0 / fan6) ** 0.5                   # kaiming_uniform_(a=1)
    b7_bound = (3.0 / rep_size) ** 0.5
    w6_t = jax.random.uniform(k6, (rep_size, fan6), jnp.float32, -b6_bound, b6_bound)
    w7_t = jax.random.uniform(k7, (rep_size, rep_size), jnp.float32, -b7_bound, b7_bound)
    return {
        # torch Linear weight is [out, in] over (c, ph, pw); pooled output below is
        # already in (c, ph, pw) order, so a plain transpose suffices.  Weights are
        # pre-cast to bf16 offline (MXU full rate, half the HBM/DMA bytes).
        "w6": w6_t.T.astype(jnp.bfloat16),                       # [K, D]
        "b6": jnp.zeros((1, rep_size), jnp.float32),             # nn.init.constant_(0)
        "w7": w7_t.T.astype(jnp.bfloat16),                       # [D, D]
        "b7": jnp.zeros((1, rep_size), jnp.float32),
    }


# ----------------------------------------------------------------------------
# Full extractor forward: Pooler(ROIAlign) -> flatten -> fc6 -> relu -> fc7 -> relu
# ----------------------------------------------------------------------------
def fpn2mlp_forward(feat_nchw, rois, params, resolution, spatial_scale, sampling_ratio):
    pooled = roi_align_pooler(feat_nchw, rois, resolution, spatial_scale, sampling_ratio)
    x = pooled.reshape(pooled.shape[0], -1)          # == torch x.view(R, -1), (c, ph, pw)
    return fused_mlp(x, params["w6"], params["b6"], params["w7"], params["b7"])


if __name__ == "__main__":
    # Small synthetic config, same wiring as the real module:
    #   POOLER_RESOLUTION=8, POOLER_SCALES=(0.25,), POOLER_SAMPLING_RATIO=2
    #   BACKBONE.OUT_CHANNELS=32, MLP_HEAD_DIM=256
    N, C, H, W = 2, 32, 16, 16
    resolution, spatial_scale, sampling_ratio = 8, 0.25, 2
    rep_size = 256

    key = jax.random.PRNGKey(0)
    kx, kp = jax.random.split(key)

    feats = jax.random.normal(kx, (N, C, H, W), dtype=jnp.float32)      # single FPN level, NCHW
    rois = jnp.array(                                                    # (batch, x1, y1, x2, y2)
        [[0.0, 4.0, 4.0, 40.0, 36.0],
         [0.0, 10.0, 2.0, 50.0, 60.0],
         [1.0, 0.0, 0.0, 63.0, 63.0],
         [1.0, 8.0, 8.0, 30.0, 44.0],
         [0.0, 20.0, 16.0, 60.0, 48.0],
         [1.0, 2.0, 30.0, 58.0, 62.0]], dtype=jnp.float32)

    params = make_mlp_params(kp, C, resolution, rep_size)

    fwd = jax.jit(lambda f, r, p: fpn2mlp_forward(
        f, r, p, resolution, spatial_scale, sampling_ratio))
    out = jax.block_until_ready(fwd(feats, rois, params))

    assert out.shape == (rois.shape[0], rep_size), out.shape
    assert out.dtype == jnp.float32
    assert bool(jnp.all(jnp.isfinite(out)))
    assert bool(jnp.all(out >= 0.0))        # final ReLU
    print("KERNEL_OK")
</pallas_src>

<mosaic_0001>
module attributes {stable_mosaic.version = 11 : i64} {
  func.func @_roi_pool_kernel(%arg0: i32, %arg1: memref<6xi32, #tpu.memory_space<smem>>, %arg2: memref<1x32x256xf32, #tpu.memory_space<vmem>>, %arg3: memref<1x256x64xf32, #tpu.memory_space<vmem>>, %arg4: memref<1x32x64xf32, #tpu.memory_space<vmem>>) attributes {dimension_semantics = [#tpu.dimension_semantics<arbitrary>], iteration_bounds = array<i64: 6>, scalar_prefetch = 1 : i64, scratch_operands = 0 : i64, tpu.core_type = #tpu.core_type<tc>, window_params = [{transform_indices = @transform_0, window_bounds = array<i64: 1, 32, 256>}, {transform_indices = @transform_1, window_bounds = array<i64: 1, 256, 64>}, {transform_indices = @transform_2, window_bounds = array<i64: 1, 32, 64>}]} {
    %c0 = arith.constant 0 : index
    %c0_0 = arith.constant 0 : index
    %c0_1 = arith.constant 0 : index
    %0 = vector.load %arg2[%c0, %c0_0, %c0_1] : memref<1x32x256xf32, #tpu.memory_space<vmem>>, vector<1x32x256xf32>
    %1 = vector.shape_cast %0 : vector<1x32x256xf32> to vector<32x256xf32>
    %c0_2 = arith.constant 0 : index
    %c0_3 = arith.constant 0 : index
    %c0_4 = arith.constant 0 : index
    %2 = vector.load %arg3[%c0_2, %c0_3, %c0_4] : memref<1x256x64xf32, #tpu.memory_space<vmem>>, vector<1x256x64xf32>
    %3 = vector.shape_cast %2 : vector<1x256x64xf32> to vector<256x64xf32>
    %cst = arith.constant dense<0.000000e+00> : vector<32x64xf32>
    %4 = tpu.matmul %1, %3, %cst {dimension_numbers = #tpu.dot_dimension_numbers<[1], [0], [0], [1], [0, 0, 1, 1], [], []>} : vector<32x256xf32>, vector<256x64xf32>, vector<32x64xf32> -> vector<32x64xf32>
    %c0_5 = arith.constant 0 : index
    %c0_6 = arith.constant 0 : index
    %c0_7 = arith.constant 0 : index
    %5 = vector.load %arg4[%c0_5, %c0_6, %c0_7] : memref<1x32x64xf32, #tpu.memory_space<vmem>>, vector<1x32x64xf32>
    %6 = vector.shape_cast %5 : vector<1x32x64xf32> to vector<32x64xf32>
    %7 = vector.shape_cast %4 : vector<32x64xf32> to vector<1x32x64xf32>
    tpu.vector_store %arg4[%c0_5, %c0_6, %c0_7], %7 {strides = array<i32>} : memref<1x32x64xf32, #tpu.memory_space<vmem>>, vector<1x32x64xf32>,
    return
  }
  func.func @transform_0(%arg0: i32, %arg1: memref<6xi32, #tpu.memory_space<smem>>) -> (i32, i32, i32) {
    %0 = arith.index_cast %arg0 : i32 to index
    %1 = memref.load %arg1[%0] : memref<6xi32, #tpu.memory_space<smem>>
    %c0_i32 = arith.constant 0 : i32
    %c0_i32_0 = arith.constant 0 : i32
    %c0_i32_1 = arith.constant 0 : i32
    return %1, %c0_i32, %c0_i32_0 : i32, i32, i32
  }
  func.func @transform_1(%arg0: i32, %arg1: memref<6xi32, #tpu.memory_space<smem>>) -> (i32, i32, i32) {
    %c0_i32 = arith.constant 0 : i32
    %c0_i32_0 = arith.constant 0 : i32
    %c0_i32_1 = arith.constant 0 : i32
    return %arg0, %c0_i32, %c0_i32_0 : i32, i32, i32
  }
  func.func @transform_2(%arg0: i32, %arg1: memref<6xi32, #tpu.memory_space<smem>>) -> (i32, i32, i32) {
    %c0_i32 = arith.constant 0 : i32
    %c0_i32_0 = arith.constant 0 : i32
    %c0_i32_1 = arith.constant 0 : i32
    return %arg0, %c0_i32, %c0_i32_0 : i32, i32, i32
  }
}

module attributes {stable_mosaic.version = 11 : i64} {
  func.func @_fused_mlp_kernel(%arg0: i32, %arg1: i32, %arg2: memref<8x512xbf16, #tpu.memory_space<vmem>>, %arg3: memref<512x256xbf16, #tpu.memory_space<vmem>>, %arg4: memref<1x256xf32, #tpu.memory_space<vmem>>, %arg5: memref<256x256xbf16, #tpu.memory_space<vmem>>, %arg6: memref<1x256xf32, #tpu.memory_space<vmem>>, %arg7: memref<8x256xf32, #tpu.memory_space<vmem>>, %arg8: memref<8x256xf32, #tpu.memory_space<vmem>>) attributes {dimension_semantics = [#tpu.dimension_semantics<parallel>, #tpu.dimension_semantics<arbitrary>], iteration_bounds = array<i64: 1, 4>, scalar_prefetch = 0 : i64, scratch_operands = 1 : i64, tpu.core_type = #tpu.core_type<tc>, window_params = [{transform_indices = @transform_0, window_bounds = array<i64: 8, 512>}, {transform_indices = @transform_1, window_bounds = array<i64: 512, 256>}, {pipeline_mode = #tpu.pipeline_mode<synchronous>, transform_indices = @transform_2, window_bounds = array<i64: 1, 256>}, {pipeline_mode = #tpu.pipeline_mode<synchronous>, transform_indices = @transform_3, window_bounds = array<i64: 256, 256>}, {pipeline_mode = #tpu.pipeline_mode<synchronous>, transform_indices = @transform_4, window_bounds = array<i64: 1, 256>}, {transform_indices = @transform_5, window_bounds = array<i64: 8, 256>}]} {
    %c0_i32 = arith.constant 0 : i32
    %0 = arith.cmpi eq, %arg1, %c0_i32 : i32
    %1 = arith.extui %0 : i1 to i32
    %c0_i32_0 = arith.constant 0 : i32
    %2 = arith.cmpi ne, %1, %c0_i32_0 : i32
    scf.if %2 {
      %cst_9 = arith.constant 0.000000e+00 : f32
      %12 = vector.broadcast %cst_9 : f32 to vector<8x256xf32>
      %c0_10 = arith.constant 0 : index
      %c0_11 = arith.constant 0 : index
      %13 = vector.load %arg8[%c0_10, %c0_11] : memref<8x256xf32, #tpu.memory_space<vmem>>, vector<8x256xf32>
      tpu.vector_store %arg8[%c0_10, %c0_11], %12 {strides = array<i32>} : memref<8x256xf32, #tpu.memory_space<vmem>>, vector<8x256xf32>,
    } else {
    }
    %c0 = arith.constant 0 : index
    %c0_1 = arith.constant 0 : index
    %3 = vector.load %arg8[%c0, %c0_1] : memref<8x256xf32, #tpu.memory_space<vmem>>, vector<8x256xf32>
    %c0_2 = arith.constant 0 : index
    %c0_3 = arith.constant 0 : index
    %4 = vector.load %arg2[%c0_2, %c0_3] : memref<8x512xbf16, #tpu.memory_space<vmem>>, vector<8x512xbf16>
    %c0_4 = arith.constant 0 : index
    %c0_5 = arith.constant 0 : index
    %5 = vector.load %arg3[%c0_4, %c0_5] : memref<512x256xbf16, #tpu.memory_space<vmem>>, vector<512x256xbf16>
    %cst = arith.constant dense<0.000000e+00> : vector<8x256xf32>
    %6 = tpu.matmul %4, %5, %cst {dimension_numbers = #tpu.dot_dimension_numbers<[1], [0], [0], [1], [0, 0, 1, 1], [], []>} : vector<8x512xbf16>, vector<512x256xbf16>, vector<8x256xf32> -> vector<8x256xf32>
    %7 = arith.addf %3, %6 : vector<8x256xf32>
    %c0_6 = arith.constant 0 : index
    %c0_7 = arith.constant 0 : index
    %8 = vector.load %arg8[%c0_6, %c0_7] : memref<8x256xf32, #tpu.memory_space<vmem>>, vector<8x256xf32>
    tpu.vector_store %arg8[%c0_6, %c0_7], %7 {strides = array<i32>} : memref<8x256xf32, #tpu.memory_space<vmem>>, vector<8x256xf32>,
    %c3_i32 = arith.constant 3 : i32
    %9 = arith.cmpi eq, %arg1, %c3_i32 : i32
    %10 = arith.extui %9 : i1 to i32
    %c0_i32_8 = arith.constant 0 : i32
    %11 = arith.cmpi ne, %10, %c0_i32_8 : i32
    scf.if %11 {
      %c0_9 = arith.constant 0 : index
      %c0_10 = arith.constant 0 : index
      %12 = vector.load %arg8[%c0_9, %c0_10] : memref<8x256xf32, #tpu.memory_space<vmem>>, vector<8x256xf32>
      %c0_11 = arith.constant 0 : index
      %c0_12 = arith.constant 0 : index
      %13 = vector.load %arg4[%c0_11, %c0_12] : memref<1x256xf32, #tpu.memory_space<vmem>>, vector<1x256xf32>
      %14 = vector.broadcast %13 : vector<1x256xf32> to vector<8x256xf32>
      %15 = arith.addf %12, %14 : vector<8x256xf32>
      %cst_13 = arith.constant 0.000000e+00 : f32
      %16 = vector.broadcast %cst_13 : f32 to vector<8x256xf32>
      %17 = arith.maximumf %15, %16 : vector<8x256xf32>
      %18 = arith.truncf %17 : vector<8x256xf32> to vector<8x256xbf16>
      %c0_14 = arith.constant 0 : index
      %c0_15 = arith.constant 0 : index
      %19 = vector.load %arg5[%c0_14, %c0_15] : memref<256x256xbf16, #tpu.memory_space<vmem>>, vector<256x256xbf16>
      %cst_16 = arith.constant dense<0.000000e+00> : vector<8x256xf32>
      %20 = tpu.matmul %18, %19, %cst_16 {dimension_numbers = #tpu.dot_dimension_numbers<[1], [0], [0], [1], [0, 0, 1, 1], [], []>} : vector<8x256xbf16>, vector<256x256xbf16>, vector<8x256xf32> -> vector<8x256xf32>
      %c0_17 = arith.constant 0 : index
      %c0_18 = arith.constant 0 : index
      %21 = vector.load %arg6[%c0_17, %c0_18] : memref<1x256xf32, #tpu.memory_space<vmem>>, vector<1x256xf32>
      %22 = vector.broadcast %21 : vector<1x256xf32> to vector<8x256xf32>
      %23 = arith.addf %20, %22 : vector<8x256xf32>
      %cst_19 = arith.constant 0.000000e+00 : f32
      %24 = vector.broadcast %cst_19 : f32 to vector<8x256xf32>
      %25 = arith.maximumf %23, %24 : vector<8x256xf32>
      %c0_20 = arith.constant 0 : index
      %c0_21 = arith.constant 0 : index
      %26 = vector.load %arg7[%c0_20, %c0_21] : memref<8x256xf32, #tpu.memory_space<vmem>>, vector<8x256xf32>
      tpu.vector_store %arg7[%c0_20, %c0_21], %25 {strides = array<i32>} : memref<8x256xf32, #tpu.memory_space<vmem>>, vector<8x256xf32>,
    } else {
    }
    return
  }
  func.func @transform_0(%arg0: i32, %arg1: i32) -> (i32, i32) {
    %c0_i32 = arith.constant 0 : i32
    return %arg0, %arg1 : i32, i32
  }
  func.func @transform_1(%arg0: i32, %arg1: i32) -> (i32, i32) {
    %c0_i32 = arith.constant 0 : i32
    %c0_i32_0 = arith.constant 0 : i32
    return %arg1, %c0_i32 : i32, i32
  }
  func.func @transform_2(%arg0: i32, %arg1: i32) -> (i32, i32) {
    %c0_i32 = arith.constant 0 : i32
    %c0_i32_0 = arith.constant 0 : i32
    %c0_i32_1 = arith.constant 0 : i32
    return %c0_i32, %c0_i32_0 : i32, i32
  }
  func.func @transform_3(%arg0: i32, %arg1: i32) -> (i32, i32) {
    %c0_i32 = arith.constant 0 : i32
    %c0_i32_0 = arith.constant 0 : i32
    %c0_i32_1 = arith.constant 0 : i32
    return %c0_i32, %c0_i32_0 : i32, i32
  }
  func.func @transform_4(%arg0: i32, %arg1: i32) -> (i32, i32) {
    %c0_i32 = arith.constant 0 : i32
    %c0_i32_0 = arith.constant 0 : i32
    %c0_i32_1 = arith.constant 0 : i32
    return %c0_i32, %c0_i32_0 : i32, i32
  }
  func.func @transform_5(%arg0: i32, %arg1: i32) -> (i32, i32) {
    %c0_i32 = arith.constant 0 : i32
    %c0_i32_0 = arith.constant 0 : i32
    return %arg0, %c0_i32 : i32, i32
  }
}

</mosaic_0001>

<bundles_post_ra>
// kernel: _lambda_.2
= control target key start
LH: loop header
LB: loop body
LE: loop exit
PB: predicated region body
PF: predicated region fallthrough
CT: control target
= control target key end

     0   :  { %s606_s0 = inlined_call_operand.vmem [shape: s32[6], index: 0, kind: input, shape index: {}]   ;;  %s607_s1 = inlined_call_operand.vmem [shape: f32[2,32,256], index: 1, kind: input, shape index: {}]   ;;  %s608_s2 = inlined_call_operand.vmem [shape: f32[6,256,64], index: 2, kind: input, shape index: {}]   ;;  %s609_s3 = inlined_call_operand.vmem [shape: f32[6,32,64], index: 3, kind: output, shape index: {}]  }
   0x1   :  { %s8_s14 = sshll.u32 %s606_s0, 4  ;;  %s9_s14 = int_to_ptr.vmem [resolvable:$true] %s8_s14 }
   0x2   :  { %s492_s15 = scalar_lea.vmem %s9_s14, 16  ;;  %p497_p1 = scmp.lt.s32.totalorder %s9_s14, %s9_s14 }
   0x3   :  { %p493_p0 = scmp.ne.s32.totalorder %s9_s14, %s492_s15  ;;  %p498_p2 = scmp.lt.s32.totalorder %s492_s15, %s492_s15 }
   0x5   :  { %p499_p3 = por %p498_p2, %p497_p1 }
   0x7   :  { %p500_p4 = pnand %p499_p3, %p493_p0 }
   0x9   :  { %503 = shalt.err (!%p500_p4)  }
   0xa   :  { %s514_s16 = smov [#allocation3]  }
   0xb   :  { %11 = dma.vmem_to_smem %s9_s14, 16, %s514_s16, [#allocation2] }
   0xc   :  { %508 = dma.done.wait [#allocation2], 16 }
   0xd   :  { %509 = vsyncadd [#allocation2], 4294967280 }
   0xe   :  { %13 = sfence }
   0xf   :  { %s538_s17 = smov 0  }
  0x10 LB: > { %s375_s0 = sadd.s32 4294967295, %s512_s17   ;;  %p379_p5 = scmp.ge.s32.totalorder %s512_s17, 1  ;;  %s512_s17 = sphi %s538_s17, %s19_s17  }
  0x11   : > { %p133_p6 = scmp.lt.s32.totalorder %s512_s17, 7 }
  0x13   : > { %p134_p7 = pnand %p379_p5, %p133_p6 }
  0x14   : > { %p168_p8 = scmp.lt.s32.totalorder (!%p134_p7), %s375_s0, 5  ;;  %s161_s18 = sld [smem:[#allocation3 + %s375_s0]] (!%p134_p7)  ;;  %vm303_vm0 = vcmask (!%p134_p7), 523264  }
  0x15   : > { %137 = sbr.rel (%p134_p7) target bundleno = 286 (0x11e), region = 28 }
  0x1a   : > { %p162_p9 = scmp.lt.s32.totalorder (!%p134_p7), %s161_s18, 1 }
  0x1c   : > { %s611_s0 = smov (!%p168_p8, %s375_s0), 5  ;;  %s613_s18 = smov (!%p162_p9, %s161_s18), 1 }
  0x1d   : > { %s389_s19 = sshll.u32 %s611_s0, 8  ;;  %s388_s23 = sshll.u32 %s613_s18, 6 }
  0x1e   : > { %s552_s22 = scalar_lea.vmem %s608_s2, %s389_s19  ;;  %s571_s26 = scalar_lea.vmem %s607_s1, %s388_s23 }
  0x1f   : > { %v202_v0 = vld [vmem:[%s552_s22 + $0x80] sm:$0xff]  ;;  %v203_v1 = vld [vmem:[%s552_s22 + $0x88] sm:$0xff]  ;;  %v204_v5 = vld [vmem:[%s552_s22 + $0x90] sm:$0xff]  ;;  %s390_s27 = sshll.u32 %s611_s0, 5 }
  0x20   : > { %v186_v2 = vld [vmem:[%s552_s22] sm:$0xff]  ;;  %v435_v3 = vpack.c.bf16 %v203_v1, %v202_v0  ;;  %v187_v4 = vld [vmem:[%s552_s22 + $0x8] sm:$0xff]  ;;  %v205_v6 = vld [vmem:[%s552_s22 + $0x98] sm:$0xff]  ;;  %s177_s30 = scalar_lea.vmem %s609_s3, %s390_s27 }
  0x21   : > { %v437_v7 = vpack.c.bf16 %v187_v4, %v186_v2  ;;  %v439_v8 = vpack.c.bf16 %v205_v6, %v204_v5  ;;  %v188_v9 = vld [vmem:[%s552_s22 + $0x10] sm:$0xff]  ;;  %v189_v10 = vld [vmem:[%s552_s22 + $0x18] sm:$0xff]  ;;  %v206_v11 = vld [vmem:[%s552_s22 + $0xa0] sm:$0xff] }
  0x22   : > { %436 = vmatprep.subr.bf16.mxu0 %v435_v3  ;;  %467 = vmatprep.subr.bf16.mxu1 %v435_v3  ;;  %v207_v12 = vld [vmem:[%s552_s22 + $0xa8] sm:$0xff]  ;;  %v441_v13 = vpack.c.bf16 %v189_v10, %v188_v9  ;;  %v190_v15 = vld [vmem:[%s552_s22 + $0x20] sm:$0xff]  ;;  %v208_v17 = vld [vmem:[%s552_s22 + $0xb0] sm:$0xff] }
  0x23   : > { %438 = vmatpush3.bf16.msra.mxu0 %v437_v7  ;;  %475 = vmatpush3.bf16.msra.mxu1 %v437_v7  ;;  %v443_v14 = vpack.c.bf16 %v207_v12, %v206_v11  ;;  %v191_v16 = vld [vmem:[%s552_s22 + $0x28] sm:$0xff]  ;;  %v209_v18 = vld [vmem:[%s552_s22 + $0xb8] sm:$0xff]  ;;  %v192_v21 = vld [vmem:[%s552_s22 + $0x30] sm:$0xff] }
  0x24   : > { %440 = vmatprep.subr.bf16.mxu0 %v439_v8  ;;  %468 = vmatprep.subr.bf16.mxu1 %v439_v8  ;;  %v445_v19 = vpack.c.bf16 %v191_v16, %v190_v15  ;;  %v447_v20 = vpack.c.bf16 %v209_v18, %v208_v17  ;;  %v193_v22 = vld [vmem:[%s552_s22 + $0x38] sm:$0xff]  ;;  %v210_v23 = vld [vmem:[%s552_s22 + $0xc0] sm:$0xff]  ;;  %v211_v24 = vld [vmem:[%s552_s22 + $0xc8] sm:$0xff] }
  0x25   : > { %v179_v25 = vld [vmem:[%s571_s26 + $0x8] sm:$0xff]  ;;  %v449_v27 = vpack.c.bf16 %v193_v22, %v192_v21  ;;  %v451_v28 = vpack.c.bf16 %v211_v24, %v210_v23  ;;  %v194_v29 = vld [vmem:[%s552_s22 + $0x40] sm:$0xff]  ;;  %v212_v31 = vld [vmem:[%s552_s22 + $0xd0] sm:$0xff] }
  0x26   : > { %282 = vmatprep.mubr.f32.mxu0 %v179_v25  ;;  %v183_v26 = vld [vmem:[%s571_s26 + $0x28] sm:$0xff]  ;;  %v213_v32 = vld [vmem:[%s552_s22 + $0xd8] sm:$0xff]  ;;  %v196_v35 = vld [vmem:[%s552_s22 + $0x50] sm:$0xff] }
  0x27   : > { %442 = vmatpush3.bf16.msra.mxu0 %v441_v13  ;;  %476 = vmatpush3.bf16.msra.mxu1 %v441_v13  ;;  %v195_v30 = vld [vmem:[%s552_s22 + $0x48] sm:$0xff]  ;;  %v455_v34 = vpack.c.bf16 %v213_v32, %v212_v31  ;;  %v197_v36 = vld [vmem:[%s552_s22 + $0x58] sm:$0xff]  ;;  %v214_v37 = vld [vmem:[%s552_s22 + $0xe0] sm:$0xff] }
  0x28   : > { %444 = vmatprep.subr.bf16.mxu0 %v443_v14  ;;  %469 = vmatprep.subr.bf16.mxu1 %v443_v14  ;;  %v453_v33 = vpack.c.bf16 %v195_v30, %v194_v29  ;;  %v215_v38 = vld [vmem:[%s552_s22 + $0xe8] sm:$0xff]  ;;  %v457_v39 = vpack.c.bf16 %v197_v36, %v196_v35  ;;  %v198_v41 = vld [vmem:[%s552_s22 + $0x60] sm:$0xff]  ;;  %v216_v43 = vld [vmem:[%s552_s22 + $0xf0] sm:$0xff] }
  0x29   : > { %292 = vmatprep.mubr.f32.mxu1 %v183_v26  ;;  %v459_v40 = vpack.c.bf16 %v215_v38, %v214_v37  ;;  %v199_v42 = vld [vmem:[%s552_s22 + $0x68] sm:$0xff]  ;;  %v217_v44 = vld [vmem:[%s552_s22 + $0xf8] sm:$0xff]  ;;  %v200_v47 = vld [vmem:[%s552_s22 + $0x70] sm:$0xff] }
  0x2a   : > { %v461_v45 = vpack.c.bf16 %v199_v42, %v198_v41  ;;  %v463_v46 = vpack.c.bf16 %v217_v44, %v216_v43  ;;  %v201_v48 = vld [vmem:[%s552_s22 + $0x78] sm:$0xff]  ;;  %v178_v50 = vld [vmem:[%s571_s26] sm:$0xff]  ;;  %v180_v54 = vld [vmem:[%s571_s26 + $0x10] sm:$0xff] }
  0x2b   : > { %446 = vmatpush3.bf16.msra.mxu0 %v445_v19  ;;  %477 = vmatpush3.bf16.msra.mxu1 %v445_v19  ;;  %v465_v49 = vpack.c.bf16 %v201_v48, %v200_v47  ;;  %v182_v51 = vld [vmem:[%s571_s26 + $0x20] sm:$0xff]  ;;  %v181_v52 = vld [vmem:[%s571_s26 + $0x18] sm:$0xff]  ;;  %v184_v55 = vld [vmem:[%s571_s26 + $0x30] sm:$0xff] }
  0x2c   : > { %448 = vmatprep.subr.bf16.mxu0 %v447_v20  ;;  %470 = vmatprep.subr.bf16.mxu1 %v447_v20  ;;  %v185_v53 = vld [vmem:[%s571_s26 + $0x38] sm:$0xff] }
  0x2f   : > { %450 = vmatpush3.bf16.msra.mxu0 %v449_v27  ;;  %478 = vmatpush3.bf16.msra.mxu1 %v449_v27 }
  0x30   : > { %452 = vmatprep.subr.bf16.mxu0 %v451_v28  ;;  %471 = vmatprep.subr.bf16.mxu1 %v451_v28 }
  0x33   : > { %454 = vmatpush3.bf16.msra.mxu0 %v453_v33  ;;  %479 = vmatpush3.bf16.msra.mxu1 %v453_v33 }
  0x34   : > { %456 = vmatprep.subr.bf16.mxu0 %v455_v34  ;;  %472 = vmatprep.subr.bf16.mxu1 %v455_v34 }
  0x37   : > { %458 = vmatpush3.bf16.msra.mxu0 %v457_v39  ;;  %480 = vmatpush3.bf16.msra.mxu1 %v457_v39 }
  0x38   : > { %460 = vmatprep.subr.bf16.mxu0 %v459_v40  ;;  %473 = vmatprep.subr.bf16.mxu1 %v459_v40 }
  0x3b   : > { %462 = vmatpush3.bf16.msra.mxu0 %v461_v45  ;;  %481 = vmatpush3.bf16.msra.mxu1 %v461_v45 }
  0x3c   : > { %464 = vmatprep.subr.bf16.mxu0 %v463_v46  ;;  %474 = vmatprep.subr.bf16.mxu1 %v463_v46 }
  0x3f   : > { %466 = vmatpush3.bf16.msra.mxu0 %v465_v49  ;;  %482 = vmatpush3.bf16.msra.mxu1 %v465_v49 }
  0x42   : > { %283 = vmatmul.mubr.f32.vlgmr.msra.gmra.mrb[0].mxu0 %v178_v50  ;;  %293 = vmatmul.mubr.f32.vlgmr.msra.gmra.mrb[0].mxu1 %v182_v51 }
  0x43   : > { %287 = vmatprep.mubr.f32.mxu0 %v181_v52  ;;  %297 = vmatprep.mubr.f32.mxu1 %v185_v53 }
  0x46   : > { %288 = vmatmul.mubr.f32.gmra.mrb[2].mxu0 %v180_v54  ;;  %298 = vmatmul.mubr.f32.gmra.mrb[2].mxu1 %v184_v55 }
 0x115   : > { %v423_v56 = vpop.f32.mrb[0].mxu0  ;;  %v429_v57 = vpop.f32.mrb[0].mxu1 }
 0x116   : > { %v424_v58 = vpop.f32.mrb[1].mxu0  ;;  %v430_v59 = vpop.f32.mrb[1].mxu1 }
 0x117   : > { %v425_v60 = vadd.f32 %v424_v58, %v423_v56  ;;  %v431_v61 = vadd.f32 %v430_v59, %v429_v57 }
 0x119   : > { %304 = vst.msk [vmem:[%s177_s30] sm:$0xff] %vm303_vm0, %v425_v60  ;;  %306 = vst.msk [vmem:[%s177_s30 + $0x10] sm:$0xff] %vm303_vm0, %v431_v61  ;;  %v426_v62 = vpop.f32.mrb[2].mxu0  ;;  %v432_v63 = vpop.f32.mrb[2].mxu1 }
 0x11a   : > { %v427_v0 = vpop.f32.mrb[3].mxu0  ;;  %v433_v1 = vpop.f32.mrb[3].mxu1 }
 0x11b   : > { %v428_v2 = vadd.f32 %v427_v0, %v426_v62  ;;  %v434_v3 = vadd.f32 %v433_v1, %v432_v63 }
 0x11d   : > { %305 = vst.msk [vmem:[%s177_s30 + $0x8] sm:$0xff] %vm303_vm0, %v428_v2  ;;  %307 = vst.msk [vmem:[%s177_s30 + $0x18] sm:$0xff] %vm303_vm0, %v434_v3 }
 0x11e PF: > { %s19_s17 = sadd.s32 1, %s512_s17  }
 0x11f   : > { %p16_p10 = scmp.ge.s32.totalorder %s19_s17, 8  }
 0x121   :  { %18 = sbr.rel (!%p16_p10) target bundleno = 16 (0x10), region = 61 }

// kernel: _lambda_.3
= control target key start
LH: loop header
LB: loop body
LE: loop exit
PB: predicated region body
PF: predicated region fallthrough
CT: control target
= control target key end

     0   :  { %10 = vsyncpa [#allocation4], 0  ;;  %s1496_s18 = smov 0   ;;  %s1498_s19 = smov 0   ;;  %s1740_s0 = inlined_call_operand.vmem [shape: bf16[8,2048], index: 0, kind: input, shape index: {}]   ;;  %s1741_s1 = inlined_call_operand.vmem [shape: bf16[2048,256], index: 1, kind: input, shape index: {}]   ;;  %s1742_s2 = inlined_call_operand.vmem [shape: f32[1,256], index: 2, kind: input, shape index: {}]   ;;  %s1743_s3 = inlined_call_operand.vmem [shape: bf16[256,256], index: 3, kind: input, shape index: {}]   ;;  %s1744_s4 = inlined_call_operand.vmem [shape: f32[1,256], index: 4, kind: input, shape index: {}]   ;;  %s1745_s5 = inlined_call_operand.hbm [shape: f32[8,256], index: 5, kind: output, shape index: {}]  }
   0x1   :  { %s1500_s20 = smov 0  }
   0x2 LB: > { %s1114_s21 = sadd.s32 4294967295, %s1462_s20   ;;  %s25_s22 = sadd.s32 1, %s1458_s19  ;;  %s1462_s20 = sphi %s1500_s20, %s16_s20   ;;  %s1458_s19 = sphi %s1498_s19, %s1748_s19   ;;  %s1454_s18 = sphi %s1496_s18, %s1747_s18  }
   0x3   : > { %p26_p0 = scmp.ge.s32.totalorder %s25_s22, 4  ;;  %p1117_p1 = scmp.ge.s32.totalorder %s1462_s20, 1 }
   0x4   : > { %p219_p2 = scmp.lt.s32.totalorder %s1462_s20, 5 }
   0x5   : > { %s1750_s22 = smov (%p26_p0, %s25_s22), 0 }
   0x6   : > { %p220_p3 = pnand %p1117_p1, %p219_p2 }
   0x7   : > { %s1118_s23 = sshll.u32 (!%p220_p3), %s1454_s18, 2  ;;  %s1120_s24 = sshll.u32 (!%p220_p3), %s1454_s18, 6 }
   0x8   : > { %223 = sbr.rel (%p220_p3) target bundleno = 566 (0x236), region = 40  ;;  %p255_p4 = scmp.lt.s32.totalorder (!%p220_p3), %s1118_s23, 15 }
   0x9   : > { %p263_p5 = scmp.lt.s32.totalorder (!%p220_p3), %s1120_s24, 255  ;;  %p1123_p6 = scmp.ne.s32.totalorder (!%p220_p3), %s1454_s18, 0 }
   0xf   : > { %s1752_s23 = smov (!%p255_p4, %s1118_s23), 15  ;;  %s1754_s24 = smov (!%p263_p5, %s1120_s24), 255 }
  0x10   : > { %s1119_s25 = sshll.u32 %s1752_s23, 2  ;;  %s1229_s29 = sshll.u32 %s1754_s24, 3  ;;  %v1464_v0 = vmov (!%p1123_p6), 0.0  }
  0x11   : > { %s1522_s28 = scalar_lea.vmem %s1740_s0, %s1119_s25  ;;  %s1527_s7 = scalar_lea.vmem %s1741_s1, %s1229_s29  ;;  %273 = vst [vmem:[#allocation2] sm:$0xff] (!%p1123_p6), %v1464_v0  ;;  %274 = vst [vmem:[#allocation2 + $0x8] sm:$0xff] (!%p1123_p6), %v1464_v0 }
  0x12   : > { %272 = sbr.rel (%p1123_p6) target bundleno = 25 (0x19), region = 44 }
  0x19 PF: > { %v1262_v1 = vld [vmem:[%s1527_s7 + $0x4] ss:$8 sps:$4 sm:$0xff]   ;;  %v1266_v3 = vld [vmem:[%s1527_s7] ss:$8 sps:$4 sm:$0xff]   ;;  %v1268_v5 = vld [vmem:[%s1527_s7 + $0x14] ss:$8 sps:$4 sm:$0xff]  }
  0x1a   : > { %v1264_v2 = vld [vmem:[%s1527_s7 + $0x104] ss:$8 sps:$4 sm:$0xff]   ;;  %677 = vmatprep.subr.bf16.mxu0 %v1262_v1  ;;  %v1267_v4 = vld [vmem:[%s1527_s7 + $0x100] ss:$8 sps:$4 sm:$0xff]   ;;  %v1270_v6 = vld [vmem:[%s1527_s7 + $0x114] ss:$8 sps:$4 sm:$0xff]  }
  0x1b   : > { %718 = vmatprep.subr.bf16.mxu1 %v1264_v2  ;;  %678 = vmatpush1.bf16.msra.mxu0 %v1266_v3  ;;  %v1272_v7 = vld [vmem:[%s1527_s7 + $0x10] ss:$8 sps:$4 sm:$0xff]   ;;  %v1274_v9 = vld [vmem:[%s1527_s7 + $0x24] ss:$8 sps:$4 sm:$0xff]   ;;  %v1278_v11 = vld [vmem:[%s1527_s7 + $0x20] ss:$8 sps:$4 sm:$0xff]  }
  0x1c   : > { %719 = vmatpush1.bf16.msra.mxu1 %v1267_v4  ;;  %679 = vmatprep.subr.bf16.mxu0 %v1268_v5  ;;  %v1273_v8 = vld [vmem:[%s1527_s7 + $0x110] ss:$8 sps:$4 sm:$0xff]   ;;  %v1276_v10 = vld [vmem:[%s1527_s7 + $0x124] ss:$8 sps:$4 sm:$0xff]   ;;  %v1279_v12 = vld [vmem:[%s1527_s7 + $0x120] ss:$8 sps:$4 sm:$0xff]  }
  0x1d   : > { %720 = vmatprep.subr.bf16.mxu1 %v1270_v6  ;;  %v1280_v13 = vld [vmem:[%s1527_s7 + $0x34] ss:$8 sps:$4 sm:$0xff]   ;;  %v1284_v15 = vld [vmem:[%s1527_s7 + $0x30] ss:$8 sps:$4 sm:$0xff]   ;;  %v1286_v17 = vld [vmem:[%s1527_s7 + $0x44] ss:$8 sps:$4 sm:$0xff]  }
  0x1e   : > { %v1282_v14 = vld [vmem:[%s1527_s7 + $0x134] ss:$8 sps:$4 sm:$0xff]   ;;  %v1285_v16 = vld [vmem:[%s1527_s7 + $0x130] ss:$8 sps:$4 sm:$0xff]   ;;  %v1288_v18 = vld [vmem:[%s1527_s7 + $0x144] ss:$8 sps:$4 sm:$0xff]  }
  0x1f   : > { %680 = vmatpush1.bf16.msra.mxu0 %v1272_v7  ;;  %v1290_v19 = vld [vmem:[%s1527_s7 + $0x40] ss:$8 sps:$4 sm:$0xff]   ;;  %v1292_v21 = vld [vmem:[%s1527_s7 + $0x54] ss:$8 sps:$4 sm:$0xff]   ;;  %v1296_v23 = vld [vmem:[%s1527_s7 + $0x50] ss:$8 sps:$4 sm:$0xff]  }
  0x20   : > { %721 = vmatpush1.bf16.msra.mxu1 %v1273_v8  ;;  %681 = vmatprep.subr.bf16.mxu0 %v1274_v9  ;;  %v1291_v20 = vld [vmem:[%s1527_s7 + $0x140] ss:$8 sps:$4 sm:$0xff]   ;;  %v1294_v22 = vld [vmem:[%s1527_s7 + $0x154] ss:$8 sps:$4 sm:$0xff]   ;;  %v1297_v24 = vld [vmem:[%s1527_s7 + $0x150] ss:$8 sps:$4 sm:$0xff]  }
  0x21   : > { %722 = vmatprep.subr.bf16.mxu1 %v1276_v10  ;;  %v1298_v25 = vld [vmem:[%s1527_s7 + $0x64] ss:$8 sps:$4 sm:$0xff]   ;;  %v1302_v27 = vld [vmem:[%s1527_s7 + $0x60] ss:$8 sps:$4 sm:$0xff]   ;;  %v1304_v29 = vld [vmem:[%s1527_s7 + $0x74] ss:$8 sps:$4 sm:$0xff]  }
  0x22   : > { %v1300_v26 = vld [vmem:[%s1527_s7 + $0x164] ss:$8 sps:$4 sm:$0xff]   ;;  %v1303_v28 = vld [vmem:[%s1527_s7 + $0x160] ss:$8 sps:$4 sm:$0xff]   ;;  %v1306_v30 = vld [vmem:[%s1527_s7 + $0x174] ss:$8 sps:$4 sm:$0xff]  }
  0x23   : > { %682 = vmatpush1.bf16.msra.mxu0 %v1278_v11  ;;  %v1308_v31 = vld [vmem:[%s1527_s7 + $0x70] ss:$8 sps:$4 sm:$0xff]   ;;  %v1310_v33 = vld [vmem:[%s1527_s7 + $0x84] ss:$8 sps:$4 sm:$0xff]   ;;  %v1314_v35 = vld [vmem:[%s1527_s7 + $0x80] ss:$8 sps:$4 sm:$0xff]  }
  0x24   : > { %723 = vmatpush1.bf16.msra.mxu1 %v1279_v12  ;;  %683 = vmatprep.subr.bf16.mxu0 %v1280_v13  ;;  %v1309_v32 = vld [vmem:[%s1527_s7 + $0x170] ss:$8 sps:$4 sm:$0xff]   ;;  %v1312_v34 = vld [vmem:[%s1527_s7 + $0x184] ss:$8 sps:$4 sm:$0xff]   ;;  %v1315_v36 = vld [vmem:[%s1527_s7 + $0x180] ss:$8 sps:$4 sm:$0xff]  }
  0x25   : > { %724 = vmatprep.subr.bf16.mxu1 %v1282_v14  ;;  %v1316_v37 = vld [vmem:[%s1527_s7 + $0x94] ss:$8 sps:$4 sm:$0xff]   ;;  %v1320_v39 = vld [vmem:[%s1527_s7 + $0x90] ss:$8 sps:$4 sm:$0xff]   ;;  %v1322_v41 = vld [vmem:[%s1527_s7 + $0xa4] ss:$8 sps:$4 sm:$0xff]  }
  0x26   : > { %v1318_v38 = vld [vmem:[%s1527_s7 + $0x194] ss:$8 sps:$4 sm:$0xff]   ;;  %v1321_v40 = vld [vmem:[%s1527_s7 + $0x190] ss:$8 sps:$4 sm:$0xff]   ;;  %v1324_v42 = vld [vmem:[%s1527_s7 + $0x1a4] ss:$8 sps:$4 sm:$0xff]  }
  0x27   : > { %684 = vmatpush1.bf16.msra.mxu0 %v1284_v15  ;;  %v1326_v43 = vld [vmem:[%s1527_s7 + $0xa0] ss:$8 sps:$4 sm:$0xff]   ;;  %v1328_v45 = vld [vmem:[%s1527_s7 + $0xb4] ss:$8 sps:$4 sm:$0xff]   ;;  %v1332_v50 = vld [vmem:[%s1527_s7 + $0xb0] ss:$8 sps:$4 sm:$0xff]  }
  0x28   : > { %725 = vmatpush1.bf16.msra.mxu1 %v1285_v16  ;;  %685 = vmatprep.subr.bf16.mxu0 %v1286_v17  ;;  %v1327_v44 = vld [vmem:[%s1527_s7 + $0x1a0] ss:$8 sps:$4 sm:$0xff]   ;;  %v1330_v46 = vld [vmem:[%s1527_s7 + $0x1b4] ss:$8 sps:$4 sm:$0xff]   ;;  %v1333_v51 = vld [vmem:[%s1527_s7 + $0x1b0] ss:$8 sps:$4 sm:$0xff]  }
  0x29   : > { %726 = vmatprep.subr.bf16.mxu1 %v1288_v18  ;;  %v277_v47 = vld [vmem:[%s1522_s28] sm:$0xff]  ;;  %v278_v49 = vld [vmem:[%s1522_s28 + $0x8] sm:$0xff]  ;;  %v1340_v57 = vld [vmem:[%s1527_s7 + $0xd4] ss:$8 sps:$4 sm:$0xff]   ;;  %p1192_p7 = scmp.ne.s32.totalorder %s1454_s18, 3 }
  0x2a   : > { %v1125_v48 = vcombine.high %v277_v47, %v277_v47  ;;  %v1127_v52 = vcombine.high %v278_v49, %v278_v49  ;;  %v1334_v53 = vld [vmem:[%s1527_s7 + $0xc4] ss:$8 sps:$4 sm:$0xff]   ;;  %v1338_v55 = vld [vmem:[%s1527_s7 + $0xc0] ss:$8 sps:$4 sm:$0xff]   ;;  %v1342_v58 = vld [vmem:[%s1527_s7 + $0x1d4] ss:$8 sps:$4 sm:$0xff]   ;;  %v1124_v5 = vcombine.low %v277_v47, %v277_v47  ;;  %v1126_v6 = vcombine.low %v278_v49, %v278_v49 }
  0x2b   : > { %686 = vmatpush1.bf16.msra.mxu0 %v1290_v19  ;;  %v1336_v54 = vld [vmem:[%s1527_s7 + $0x1c4] ss:$8 sps:$4 sm:$0xff]   ;;  %v1339_v56 = vld [vmem:[%s1527_s7 + $0x1c0] ss:$8 sps:$4 sm:$0xff]   ;;  %v1344_v59 = vld [vmem:[%s1527_s7 + $0xd0] ss:$8 sps:$4 sm:$0xff]  }
  0x2c   : > { %727 = vmatpush1.bf16.msra.mxu1 %v1291_v20  ;;  %687 = vmatprep.subr.bf16.mxu0 %v1292_v21  ;;  %v1345_v60 = vld [vmem:[%s1527_s7 + $0x1d0] ss:$8 sps:$4 sm:$0xff]   ;;  %v1346_v61 = vld [vmem:[%s1527_s7 + $0xe4] ss:$8 sps:$4 sm:$0xff]   ;;  %v1350_v63 = vld [vmem:[%s1527_s7 + $0xe0] ss:$8 sps:$4 sm:$0xff]  }
  0x2d   : > { %728 = vmatprep.subr.bf16.mxu1 %v1294_v22  ;;  %709 = vmatprep.mubr.bf16.mxu0 %v1125_v48  ;;  %v1348_v62 = vld [vmem:[%s1527_s7 + $0x1e4] ss:$8 sps:$4 sm:$0xff]   ;;  %v1351_v0 = vld [vmem:[%s1527_s7 + $0x1e0] ss:$8 sps:$4 sm:$0xff]   ;;  %v1352_v1 = vld [vmem:[%s1527_s7 + $0xf4] ss:$8 sps:$4 sm:$0xff]  }
  0x2e   : > { %750 = vmatprep.mubr.bf16.mxu1 %v1127_v52  ;;  %v1354_v2 = vld [vmem:[%s1527_s7 + $0x1f4] ss:$8 sps:$4 sm:$0xff]   ;;  %v1356_v3 = vld [vmem:[%s1527_s7 + $0xf0] ss:$8 sps:$4 sm:$0xff]   ;;  %v275_v8 = vld [vmem:[#allocation2] sm:$0xff] }
  0x2f   : > { %688 = vmatpush1.bf16.msra.mxu0 %v1296_v23  ;;  %v1357_v4 = vld [vmem:[%s1527_s7 + $0x1f0] ss:$8 sps:$4 sm:$0xff]   ;;  %v276_v12 = vld [vmem:[#allocation2 + $0x8] sm:$0xff]  ;;  %v1365_v23 = vld [vmem:[%s1743_s3 + $0x14] ss:$8 sps:$4 sm:$0xff] (!%p1192_p7)  }
  0x30   : > { %729 = vmatpush1.bf16.msra.mxu1 %v1297_v24  ;;  %689 = vmatprep.subr.bf16.mxu0 %v1298_v25  ;;  %v1362_v21 = vld [vmem:[%s1743_s3 + $0x4] ss:$8 sps:$4 sm:$0xff] (!%p1192_p7)   ;;  %v1364_v22 = vld [vmem:[%s1743_s3] ss:$8 sps:$4 sm:$0xff] (!%p1192_p7)   ;;  %v1367_v24 = vld [vmem:[%s1743_s3 + $0x10] ss:$8 sps:$4 sm:$0xff] (!%p1192_p7)  }
  0x31   : > { %730 = vmatprep.subr.bf16.mxu1 %v1300_v26  ;;  %v1368_v25 = vld [vmem:[%s1743_s3 + $0x24] ss:$8 sps:$4 sm:$0xff] (!%p1192_p7)   ;;  %v1370_v26 = vld [vmem:[%s1743_s3 + $0x20] ss:$8 sps:$4 sm:$0xff] (!%p1192_p7)   ;;  %v1389_v48 = vld [vmem:[%s1743_s3 + $0x94] ss:$8 sps:$4 sm:$0xff] (!%p1192_p7)  }
  0x32   : > { %v1388_v47 = vld [vmem:[%s1743_s3 + $0x80] ss:$8 sps:$4 sm:$0xff] (!%p1192_p7)   ;;  %v1391_v49 = vld [vmem:[%s1743_s3 + $0x90] ss:$8 sps:$4 sm:$0xff] (!%p1192_p7)   ;;  %v1395_v52 = vld [vmem:[%s1743_s3 + $0xb4] ss:$8 sps:$4 sm:$0xff] (!%p1192_p7)  }
  0x33   : > { %690 = vmatpush1.bf16.msra.mxu0 %v1302_v27  ;;  %v1371_v27 = vld [vmem:[%s1743_s3 + $0x34] ss:$8 sps:$4 sm:$0xff] (!%p1192_p7)  }
  0x34   : > { %731 = vmatpush1.bf16.msra.mxu1 %v1303_v28  ;;  %691 = vmatprep.subr.bf16.mxu0 %v1304_v29  ;;  %v771_v28 = vlaneseq (!%p1192_p7)  ;;  %v1373_v29 = vld [vmem:[%s1743_s3 + $0x30] ss:$8 sps:$4 sm:$0xff] (!%p1192_p7)  }
  0x35   : > { %732 = vmatprep.subr.bf16.mxu1 %v1306_v30  ;;  %v1374_v30 = vld [vmem:[%s1743_s3 + $0x44] ss:$8 sps:$4 sm:$0xff] (!%p1192_p7)  }
  0x37   : > { %692 = vmatpush1.bf16.msra.mxu0 %v1308_v31  ;;  %v1624_v31 = vshrl.u32 (!%p1192_p7), %v771_v28, 7 }
  0x38   : > { %733 = vmatpush1.bf16.msra.mxu1 %v1309_v32  ;;  %693 = vmatprep.subr.bf16.mxu0 %v1310_v33  ;;  %v1376_v32 = vld [vmem:[%s1743_s3 + $0x40] ss:$8 sps:$4 sm:$0xff] (!%p1192_p7)   ;;  %v1377_v33 = vld [vmem:[%s1743_s3 + $0x54] ss:$8 sps:$4 sm:$0xff] (!%p1192_p7)  }
  0x39   : > { %734 = vmatprep.subr.bf16.mxu1 %v1312_v34  ;;  %v777_v34 = vsub.s32 (!%p1192_p7), 1, %v1624_v31 }
  0x3b   : > { %694 = vmatpush1.bf16.msra.mxu0 %v1314_v35  ;;  %v1379_v35 = vld [vmem:[%s1743_s3 + $0x50] ss:$8 sps:$4 sm:$0xff] (!%p1192_p7)  }
  0x3c   : > { %735 = vmatpush1.bf16.msra.mxu1 %v1315_v36  ;;  %695 = vmatprep.subr.bf16.mxu0 %v1316_v37  ;;  %v1380_v36 = vld [vmem:[%s1743_s3 + $0x64] ss:$8 sps:$4 sm:$0xff] (!%p1192_p7)  }
  0x3d   : > { %736 = vmatprep.subr.bf16.mxu1 %v1318_v38  ;;  %v769_v38 = vld [vmem:[%s1742_s2] sm:$0x3] (!%p1192_p7) }
  0x3f   : > { %696 = vmatpush1.bf16.msra.mxu0 %v1320_v39  ;;  %v778_v39 = vrot.slane (!%p1192_p7), %v769_v38, %v777_v34 }
  0x40   : > { %737 = vmatpush1.bf16.msra.mxu1 %v1321_v40  ;;  %697 = vmatprep.subr.bf16.mxu0 %v1322_v41  ;;  %v1382_v40 = vld [vmem:[%s1743_s3 + $0x60] ss:$8 sps:$4 sm:$0xff] (!%p1192_p7)   ;;  %v1383_v41 = vld [vmem:[%s1743_s3 + $0x74] ss:$8 sps:$4 sm:$0xff] (!%p1192_p7)  }
  0x41   : > { %738 = vmatprep.subr.bf16.mxu1 %v1324_v42 }
  0x43   : > { %698 = vmatpush1.bf16.msra.mxu0 %v1326_v43 }
  0x44   : > { %739 = vmatpush1.bf16.msra.mxu1 %v1327_v44  ;;  %699 = vmatprep.subr.bf16.mxu0 %v1328_v45  ;;  %v1385_v44 = vld [vmem:[%s1743_s3 + $0x70] ss:$8 sps:$4 sm:$0xff] (!%p1192_p7)   ;;  %v1386_v45 = vld [vmem:[%s1743_s3 + $0x84] ss:$8 sps:$4 sm:$0xff] (!%p1192_p7)  }
  0x45   : > { %740 = vmatprep.subr.bf16.mxu1 %v1330_v46 }
  0x47   : > { %700 = vmatpush1.bf16.msra.mxu0 %v1332_v50  ;;  %v1392_v50 = vld [vmem:[%s1743_s3 + $0xa4] ss:$8 sps:$4 sm:$0xff] (!%p1192_p7)  }
  0x48   : > { %741 = vmatpush1.bf16.msra.mxu1 %v1333_v51  ;;  %701 = vmatprep.subr.bf16.mxu0 %v1334_v53  ;;  %v1394_v51 = vld [vmem:[%s1743_s3 + $0xa0] ss:$8 sps:$4 sm:$0xff] (!%p1192_p7)   ;;  %v1397_v53 = vld [vmem:[%s1743_s3 + $0xb0] ss:$8 sps:$4 sm:$0xff] (!%p1192_p7)  }
  0x49   : > { %742 = vmatprep.subr.bf16.mxu1 %v1336_v54  ;;  %v1398_v54 = vld [vmem:[%s1743_s3 + $0xc4] ss:$8 sps:$4 sm:$0xff] (!%p1192_p7)  }
  0x4b   : > { %702 = vmatpush1.bf16.msra.mxu0 %v1338_v55  ;;  %v773_v55 = vsub.s32 (!%p1192_p7), 0, %v1624_v31 }
  0x4c   : > { %743 = vmatpush1.bf16.msra.mxu1 %v1339_v56  ;;  %703 = vmatprep.subr.bf16.mxu0 %v1340_v57  ;;  %v1400_v56 = vld [vmem:[%s1743_s3 + $0xc0] ss:$8 sps:$4 sm:$0xff] (!%p1192_p7)   ;;  %v1401_v57 = vld [vmem:[%s1743_s3 + $0xd4] ss:$8 sps:$4 sm:$0xff] (!%p1192_p7)  }
  0x4d   : > { %744 = vmatprep.subr.bf16.mxu1 %v1342_v58  ;;  %v774_v58 = vrot.slane (!%p1192_p7), %v769_v38, %v773_v55 }
  0x4f   : > { %704 = vmatpush1.bf16.msra.mxu0 %v1344_v59  ;;  %v1403_v59 = vld [vmem:[%s1743_s3 + $0xd0] ss:$8 sps:$4 sm:$0xff] (!%p1192_p7)  }
  0x50   : > { %745 = vmatpush1.bf16.msra.mxu1 %v1345_v60  ;;  %705 = vmatprep.subr.bf16.mxu0 %v1346_v61  ;;  %v1404_v61 = vld [vmem:[%s1743_s3 + $0xe4] ss:$8 sps:$4 sm:$0xff] (!%p1192_p7)  }
  0x51   : > { %746 = vmatprep.subr.bf16.mxu1 %v1348_v62 }
  0x53   : > { %706 = vmatpush1.bf16.msra.mxu0 %v1350_v63  ;;  %v1406_v63 = vld [vmem:[%s1743_s3 + $0xe0] ss:$8 sps:$4 sm:$0xff] (!%p1192_p7)  }
  0x54   : > { %747 = vmatpush1.bf16.msra.mxu1 %v1351_v0  ;;  %707 = vmatprep.subr.bf16.mxu0 %v1352_v1  ;;  %v1407_v0 = vld [vmem:[%s1743_s3 + $0xf4] ss:$8 sps:$4 sm:$0xff] (!%p1192_p7)  }
  0x55   : > { %748 = vmatprep.subr.bf16.mxu1 %v1354_v2  ;;  %v1409_v2 = vld [vmem:[%s1743_s3 + $0xf0] ss:$8 sps:$4 sm:$0xff] (!%p1192_p7)  }
  0x57   : > { %708 = vmatpush1.bf16.msra.mxu0 %v1356_v3 }
  0x58   : > { %749 = vmatpush1.bf16.msra.mxu1 %v1357_v4  ;;  %991 = vmatprep.subr.bf16.mxu0 (!%p1192_p7), %v1362_v21  ;;  %v819_v4 = vld [vmem:[%s1744_s4] sm:$0x3] (!%p1192_p7) }
  0x5a   : > { %710 = vmatmul.mubr.bf16.vlgmr.msra.gmra.mrb[0].mxu0 %v1124_v5  ;;  %v824_v5 = vrot.slane (!%p1192_p7), %v819_v4, %v773_v55 }
  0x5b   : > { %751 = vmatmul.mubr.bf16.vlgmr.msra.gmra.mrb[0].mxu1 %v1126_v6  ;;  %992 = vmatpush1.bf16.msra.mxu0 (!%p1192_p7), %v1364_v22  ;;  %v828_v6 = vrot.slane (!%p1192_p7), %v819_v4, %v777_v34 }
  0x5c   : > { %993 = vmatprep.subr.bf16.mxu0 (!%p1192_p7), %v1365_v23 }
  0x5f   : > { %994 = vmatpush1.bf16.msra.mxu0 (!%p1192_p7), %v1367_v24 }
  0x60   : > { %995 = vmatprep.subr.bf16.mxu0 (!%p1192_p7), %v1368_v25 }
  0x63   : > { %996 = vmatpush1.bf16.msra.mxu0 (!%p1192_p7), %v1370_v26 }
  0x64   : > { %997 = vmatprep.subr.bf16.mxu0 (!%p1192_p7), %v1371_v27 }
  0x67   : > { %998 = vmatpush1.bf16.msra.mxu0 (!%p1192_p7), %v1373_v29 }
  0x68   : > { %999 = vmatprep.subr.bf16.mxu0 (!%p1192_p7), %v1374_v30 }
  0x6b   : > { %1000 = vmatpush1.bf16.msra.mxu0 (!%p1192_p7), %v1376_v32 }
  0x6c   : > { %1001 = vmatprep.subr.bf16.mxu0 (!%p1192_p7), %v1377_v33 }
  0x6f   : > { %1002 = vmatpush1.bf16.msra.mxu0 (!%p1192_p7), %v1379_v35 }
  0x70   : > { %1003 = vmatprep.subr.bf16.mxu0 (!%p1192_p7), %v1380_v36 }
  0x73   : > { %1004 = vmatpush1.bf16.msra.mxu0 (!%p1192_p7), %v1382_v40 }
  0x74   : > { %1005 = vmatprep.subr.bf16.mxu0 (!%p1192_p7), %v1383_v41 }
  0x77   : > { %1006 = vmatpush1.bf16.msra.mxu0 (!%p1192_p7), %v1385_v44 }
  0x78   : > { %1007 = vmatprep.subr.bf16.mxu0 (!%p1192_p7), %v1386_v45 }
  0x7b   : > { %1008 = vmatpush1.bf16.msra.mxu0 (!%p1192_p7), %v1388_v47 }
  0x7c   : > { %1009 = vmatprep.subr.bf16.mxu0 (!%p1192_p7), %v1389_v48 }
  0x7f   : > { %1010 = vmatpush1.bf16.msra.mxu0 (!%p1192_p7), %v1391_v49 }
  0x80   : > { %1011 = vmatprep.subr.bf16.mxu0 (!%p1192_p7), %v1392_v50 }
  0x83   : > { %1012 = vmatpush1.bf16.msra.mxu0 (!%p1192_p7), %v1394_v51 }
  0x84   : > { %1013 = vmatprep.subr.bf16.mxu0 (!%p1192_p7), %v1395_v52 }
  0x87   : > { %1014 = vmatpush1.bf16.msra.mxu0 (!%p1192_p7), %v1397_v53 }
  0x88   : > { %1015 = vmatprep.subr.bf16.mxu0 (!%p1192_p7), %v1398_v54 }
  0x8b   : > { %1016 = vmatpush1.bf16.msra.mxu0 (!%p1192_p7), %v1400_v56 }
  0x8c   : > { %1017 = vmatprep.subr.bf16.mxu0 (!%p1192_p7), %v1401_v57 }
  0x8f   : > { %1018 = vmatpush1.bf16.msra.mxu0 (!%p1192_p7), %v1403_v59 }
  0x90   : > { %1019 = vmatprep.subr.bf16.mxu0 (!%p1192_p7), %v1404_v61 }
  0x93   : > { %1020 = vmatpush1.bf16.msra.mxu0 (!%p1192_p7), %v1406_v63 }
  0x94   : > { %1021 = vmatprep.subr.bf16.mxu0 (!%p1192_p7), %v1407_v0 }
  0x97   : > { %1022 = vmatpush1.bf16.msra.mxu0 (!%p1192_p7), %v1409_v2 }
 0x12d   : > { %v711_v7 = vpop.f32.mrb[0].mxu0 }
 0x12e   : > { %v752_v9 = vpop.f32.mrb[0].mxu1  ;;  %v713_v11 = vpop.f32.mrb[1].mxu0  ;;  %766 = sbr.rel (%p1192_p7) target bundleno = 541 (0x21d), region = 48 }
 0x12f   : > { %v753_v10 = vadd.f32 %v752_v9, %v711_v7  ;;  %v754_v13 = vpop.f32.mrb[1].mxu1  ;;  %v715_v15 = vpop.f32.mrb[2].mxu0 }
 0x130   : > { %v755_v14 = vadd.f32 %v754_v13, %v713_v11  ;;  %v756_v16 = vpop.f32.mrb[2].mxu1  ;;  %v716_v18 = vpop.f32.mrb[3].mxu0 }
 0x131   : > { %v759_v17 = vadd.f32 %v753_v10, %v275_v8  ;;  %v757_v19 = vpop.f32.mrb[3].mxu1 }
 0x132   : > { %v760_v20 = vadd.f32 %v755_v14, %v276_v12 }
 0x133   : > { %761 = vst [vmem:[#allocation2] sm:$0xff] %v759_v17 }
 0x134   : > { %762 = vst [vmem:[#allocation2 + $0x8] sm:$0xff] %v760_v20 }
 0x13a   : > { %v767_v60 = vld [vmem:[#allocation2] sm:$0xff] }
 0x13b   : > { %v768_v37 = vld [vmem:[#allocation2 + $0x8] sm:$0xff]  ;;  %v781_v62 = vadd.f32 %v774_v58, %v767_v60 }
 0x13c   : > { %v782_v42 = vadd.f32 %v778_v39, %v768_v37 }
 0x13d   : > { %v783_v1 = vmax.f32 %v781_v62, 0.0 }
 0x13e   : > { %v784_v43 = vmax.f32 %v782_v42, 0.0 }
 0x13f   : > { %v785_v3 = vpack.c.bf16 %v783_v1, %v783_v1 }
 0x140   : > { %v786_v46 = vpack.c.bf16 %v784_v43, %v784_v43 }
 0x142   : > { %1023 = vmatprep.mubr.bf16.mxu0 %v786_v46 }
 0x143   : > { %1024 = vmatmul.mubr.bf16.vlgmr.msra.gmra.mrb[0].mxu0 %v785_v3 }
 0x216   : > { %v1025_v7 = vpop.f32.mrb[0].mxu0 }
 0x217   : > { %v1026_v8 = vadd.f32 %v1025_v7, %v824_v5  ;;  %v1027_v9 = vpop.f32.mrb[1].mxu0 }
 0x218   : > { %v1028_v10 = vadd.f32 %v1027_v9, %v828_v6  ;;  %v1029_v11 = vpop.f32.mrb[2].mxu0 }
 0x219   : > { %v1032_v12 = vmax.f32 %v1026_v8, 0.0  ;;  %v1030_v13 = vpop.f32.mrb[3].mxu0 }
 0x21a   : > { %v1033_v14 = vmax.f32 %v1028_v10, 0.0 }
 0x21b   : > { %1034 = vst [vmem:[#allocation3] sm:$0xff] %v1032_v12 }
 0x21c   : > { %1035 = vst [vmem:[#allocation3 + $0x8] sm:$0xff] %v1033_v14 }
 0x21d PF: > { %p1705_p8 = scmp.eq.s32.totalorder %s1114_s21, 3  ;;  %s1465_s14 = smov [#allocation3]  }
 0x21e   : > { %s1046_s15 = sshll.u32 %s1465_s14, 4  ;;  %s1047_s15 = int_to_ptr.vmem [resolvable:$true] %s1046_s15 }
 0x21f   : > { %s1410_s16 = scalar_lea.vmem %s1047_s15, 256  ;;  %p1417_p12 = scmp.lt.s32.totalorder %s1047_s15, %s1047_s15 }
 0x220   : > { %p1411_p9 = scmp.ne.s32.totalorder %s1047_s15, %s1410_s16  ;;  %p1418_p13 = scmp.lt.s32.totalorder %s1410_s16, %s1410_s16 }
 0x222   : > { %p1412_p10 = pnand %p1411_p9, %p1705_p8  ;;  %p1419_p0 = por %p1418_p13, %p1417_p12 }
 0x224   : > { %p1413_p11 = pneg %p1412_p10 }
 0x226   : > { %p1420_p1 = pnand %p1419_p0, %p1413_p11 }
 0x228   : > { %1423 = shalt.err (!%p1420_p1)
}
 0x229   : > { %s1424_s21 = scalar_lea.hbm %s1745_s5, 256 }
 0x22a   : > { %p1425_p2 = scmp.ne.s32.totalorder %s1745_s5, %s1424_s21  ;;  %p1430_p5 = scmp.lt.u32.totalorder %s1424_s21, %s1745_s5 }
 0x22c   : > { %p1426_p3 = pnand %p1425_p2, %p1705_p8 }
 0x22e   : > { %p1427_p4 = pneg %p1426_p3 }
 0x230   : > { %p1432_p6 = pnand %p1430_p5, %p1427_p4 }
 0x232   : > { %1435 = shalt.err (!%p1432_p6)
}
 0x233   : > { %1231 = dma.vmem_to_hbm [thread:$0]  (%p1705_p8), %s1047_s15, 256, %s1745_s5, [#allocation4]  }
 0x234   : > { %1449 = dma.done.wait (%p1705_p8), [#allocation4], 256  }
 0x235   : > { %1451 = vsyncadd (%p1705_p8), [#allocation4], 4294967040 }
 0x236 PF: > { %s16_s20 = sadd.s32 1, %s1462_s20   ;;  %s1747_s18 = smov %s1458_s19 }
 0x237   : > { %p13_p7 = scmp.ge.s32.totalorder %s16_s20, 6   ;;  %s1748_s19 = smov %s1750_s22 }
 0x239   :  { %15 = sbr.rel (!%p13_p7) target bundleno = 2 (0x2), region = 79 }
 0x240   :  { %1059 = vsyncpa [#allocation4], 1 }
 0x241   :  { %1061 = vsyncpa [#allocation4 + $0x1], 1 }

</bundles_post_ra>
